<compile_context>
chip_gen: v6e
topology: v6e:2x2x1
jax: 0.10.0
libtpu: 0.0.40
codegen_flags: <defaults>
</compile_context>

<pallas_src>
import functools

import jax
import jax.numpy as jnp
from jax.experimental import pallas as pl
from jax.experimental.pallas import tpu as pltpu


# ---------------------------------------------------------------------------
# Rigid architecture config
# ---------------------------------------------------------------------------
NUM_LAYERS = 3
LAYER_TYPES = ['L', 'G', 'L']
DIMS = [16, 16, 8, 4]
HEADS = [1, 1, 2, 1]
CONCAT = [False, True, False]
N_NODES = 8

IN_DIM = DIMS[0]          # 16
HID_DIM = DIMS[1]         # 16
H = HEADS[2]              # 2  heads of the GATv2 layer
C = DIMS[2]               # 8  per-head channels
HC = H * C                # 16 (concat width = layer-2 input width)
OUT_DIM = DIMS[3]         # 4
NEG_SLOPE = 0.2

# --- packed parameter slab layout (single lane-aligned VMEM input) --------
SLAB_LANES = 128
COL_W0 = 0                          # rows 0:16, cols  0:16 -> W0      (16, 16)
COL_WLR = COL_W0 + HID_DIM          # rows 0:16, cols 16:48 -> [Wl|Wr] (16, 32)
COL_W2 = COL_WLR + 2 * HC           # rows 0:16, cols 48:52 -> W2      (16, 4)
COL_ATT = COL_W2 + OUT_DIM          # row  0   , cols 52:68 -> att     (1, 16)
ROW_ADJ = max(IN_DIM, HID_DIM, HC)  # 16
SLAB_ROWS = ROW_ADJ + N_NODES       # 24 rows (sublane multiple)

# --- packed output slab layout (one unmasked (N, 128) f32 vreg store) -----
OUT_LANES = 128                     # cols 0:4 -> y ; cols 4+h*N : 4+(h+1)*N -> alpha_h


# ---------------------------------------------------------------------------
# Fused kernel: Linear -> GATv2 (2 heads) -> Linear, one invocation, no grid
# ---------------------------------------------------------------------------
def _fused_forward_kernel(x_ref, p_ref, out_ref, *, n):
    # ---- carve parameters out of the packed slab (static ref slices) -----
    w0 = p_ref[0:IN_DIM, COL_W0:COL_W0 + HID_DIM]            # (16, 16)
    wlr = p_ref[0:HID_DIM, COL_WLR:COL_WLR + 2 * HC]         # (16, 32)
    att = p_ref[0:1, COL_ATT:COL_ATT + HC]                   # (1, 16) both heads
    adj = p_ref[ROW_ADJ:ROW_ADJ + n, 0:n]                    # (n, n) 0/1 floats

    # ---- layer 0: Linear(16 -> 16) + ReLU ---------------------------------
    h0 = jnp.dot(x_ref[...], w0, preferred_element_type=jnp.float32)
    h0 = jnp.maximum(h0, 0.0)

    # ---- layer 1: GATv2Conv(16 -> 8, heads=2, concat=True) + ReLU ---------
    # One matmul produces BOTH Wl and Wr projections for all heads:
    #   xlr[:, 0:HC]    = h0 @ Wl  (source-side features, all heads)
    #   xlr[:, HC:2*HC] = h0 @ Wr  (target-side features, all heads)
    xlr = jnp.dot(h0, wlr, preferred_element_type=jnp.float32)
    xl = xlr[:, 0:HC]
    xr = xlr[:, HC:2 * HC]

    # GATv2 logits, both heads in one leaky_relu / one att-multiply pass:
    #   s[i, j, h*C + c] = a_h[c] * leaky_relu(x_r[i, h*C+c] + x_l[j, h*C+c])
    s = xr[:, None, :] + xl[None, :, :]                      # (n, n, HC)
    s = jnp.where(s > 0, s, NEG_SLOPE * s)
    s = s * att[None, :, :]

    y = jnp.zeros((n, OUT_DIM), jnp.float32)
    alphas = []
    for h in range(H):                                       # static unroll
        e = jnp.sum(s[:, :, h * C:(h + 1) * C], axis=-1)     # (n, n) raw scores

        # Masked softmax over source nodes j. Row-max over ALL columns is a
        # valid stabilizer (exp argument <= 0, never overflows); non-edges
        # are zeroed by the 0/1 adjacency, and self-loops (added in the
        # wrapper) guarantee every denominator is > 0.
        e = e - jnp.max(e, axis=1, keepdims=True)
        p = jnp.exp(e) * adj
        denom = jnp.sum(p, axis=1, keepdims=True)
        alpha = p * pl.reciprocal(denom)                     # exact reciprocal
        alphas.append(alpha)

        # out_i = sum_j alpha_ij * x_l[j]; ReLU; then fold this head's slice
        # of the layer-2 weight straight into the accumulator (no lane-axis
        # concat of head outputs).
        o = jnp.dot(alpha, xl[:, h * C:(h + 1) * C],
                    preferred_element_type=jnp.float32)      # (n, C)
        o = jnp.maximum(o, 0.0)
        w2_h = p_ref[h * C:(h + 1) * C, COL_W2:COL_W2 + OUT_DIM]
        y = y + jnp.dot(o, w2_h, preferred_element_type=jnp.float32)

    # ---- single lane-dense output store: [ y | alpha_0 | alpha_1 | 0-pad ] --
    pad = jnp.zeros((n, OUT_LANES - OUT_DIM - H * n), jnp.float32)
    out_ref[...] = jnp.concatenate([y] + alphas + [pad], axis=-1)


def rigid_forward_fused(x, param_slab):
    """Single fused, gridless pallas_call for the whole L -> GAT -> L forward."""
    # TODO(synk): to exploit both v7x TensorCores, batch several graphs with a
    # leading "parallel" grid axis (or block-diagonal packing); this wrapper
    # keeps the reference single-graph semantics.
    n = x.shape[0]
    out_slab = pl.pallas_call(
        functools.partial(_fused_forward_kernel, n=n),
        out_shape=jax.ShapeDtypeStruct((n, OUT_LANES), jnp.float32),
        in_specs=[
            pl.BlockSpec(memory_space=pltpu.MemorySpace.VMEM),
            pl.BlockSpec(memory_space=pltpu.MemorySpace.VMEM),
        ],
        out_specs=pl.BlockSpec(memory_space=pltpu.MemorySpace.VMEM),
    )(x, param_slab)

    y = out_slab[:, :OUT_DIM]                                        # (n, 4)
    alpha = out_slab[:, OUT_DIM:OUT_DIM + H * n]                     # (n, H*n)
    alpha = alpha.reshape(n, H, n).transpose(1, 0, 2)                # (H, n, n)
    return y, alpha


# ---------------------------------------------------------------------------
# Model wrapper: rigid_MLP_GAT forward (L -> G -> L)
# ---------------------------------------------------------------------------
def init_params(key):
    # Layer dims follow the module __init__ bookkeeping:
    #   layer0 'L': Linear(16, 16)
    #   layer1 'G': GATv2Conv(16, 8, heads=2, concat=True, share_weights=False)
    #   layer2 'L': Linear(16, 4)   (indim = dims[2]*heads[2] because concat[1])
    k = jax.random.split(key, 5)
    scale = 0.1
    return {
        'W0':    scale * jax.random.normal(k[0], (IN_DIM, HID_DIM), jnp.float32),
        'g_Wl':  scale * jax.random.normal(k[1], (HID_DIM, HC), jnp.float32),
        'g_Wr':  scale * jax.random.normal(k[2], (HID_DIM, HC), jnp.float32),
        'g_att': scale * jax.random.normal(k[3], (H, C), jnp.float32),
        'W2':    scale * jax.random.normal(k[4], (HC, OUT_DIM), jnp.float32),
    }


def build_dense_adj(edge_index, n_nodes):
    # adj[i, j] = 1 iff there is an edge j -> i. GATv2Conv adds self loops by
    # default; the +eye also defends against adjacencies arriving without
    # them (a fully masked row would otherwise divide by zero in the softmax).
    src, dst = edge_index[0], edge_index[1]
    adj = jnp.zeros((n_nodes, n_nodes), jnp.float32).at[dst, src].set(1.0)
    adj = jnp.maximum(adj, jnp.eye(n_nodes, dtype=jnp.float32))
    return adj


def pack_params(params, adj, n):
    """Pack all weights + the dense adjacency into one (24, 128) VMEM slab."""
    wlr = jnp.concatenate([params['g_Wl'], params['g_Wr']], axis=1)   # (16, 32)
    att_flat = params['g_att'].reshape(1, HC)                         # (1, 16)
    slab = jnp.zeros((SLAB_ROWS, SLAB_LANES), jnp.float32)
    slab = slab.at[0:IN_DIM, COL_W0:COL_W0 + HID_DIM].set(params['W0'])
    slab = slab.at[0:HID_DIM, COL_WLR:COL_WLR + 2 * HC].set(wlr)
    slab = slab.at[0:HC, COL_W2:COL_W2 + OUT_DIM].set(params['W2'])
    slab = slab.at[0:1, COL_ATT:COL_ATT + HC].set(att_flat)
    slab = slab.at[ROW_ADJ:ROW_ADJ + n, 0:n].set(adj)
    return slab


def forward(x, edge_index, params):
    n = x.shape[0]
    attn_coef = [0] * NUM_LAYERS

    adj = build_dense_adj(edge_index, n)
    slab = pack_params(params, adj, n)
    out, alpha = rigid_forward_fused(x, slab)

    attn_coef[1] = (edge_index, alpha)   # dense per-head attention (H, N, N)

    # TODO(synk): smoothness-metric branches (dirEn / MAD, getMetric flags),
    # normalization layers and attention dropout are skipped; the defaults
    # (getMetric=[False,False], normalization='', dropout=0) make them no-ops
    # in the reference forward.
    smoothness_metrics = {
        'dirEn': {}, 'madGl': {}, 'madNb': {},
        'dirEnClassWise': None, 'madGlClassWise': None, 'madNbClassWise': None,
    }
    return out, attn_coef, smoothness_metrics


# ---------------------------------------------------------------------------
# Main
# ---------------------------------------------------------------------------
if __name__ == "__main__":
    key = jax.random.PRNGKey(0)
    k_x, k_p = jax.random.split(key)

    x = jax.random.normal(k_x, (N_NODES, IN_DIM), jnp.float32)

    # Undirected ring graph on 8 nodes (both directions), shape (2, 16).
    src = jnp.array([0, 1, 2, 3, 4, 5, 6, 7, 1, 2, 3, 4, 5, 6, 7, 0], jnp.int32)
    dst = jnp.array([1, 2, 3, 4, 5, 6, 7, 0, 0, 1, 2, 3, 4, 5, 6, 7], jnp.int32)
    edge_index = jnp.stack([src, dst])

    params = init_params(k_p)

    out, attn_coef, metrics = forward(x, edge_index, params)
    out = jax.block_until_ready(out)
    alpha = jax.block_until_ready(attn_coef[1][1])

    assert out.shape == (N_NODES, OUT_DIM)
    assert alpha.shape == (H, N_NODES, N_NODES)
    assert bool(jnp.all(jnp.isfinite(out)))
    # Attention rows are a proper softmax over neighbours (+self loop).
    assert bool(jnp.allclose(alpha.sum(axis=-1), 1.0, atol=1e-4))
    print("KERNEL_OK")
</pallas_src>

<mosaic_0001>
module attributes {stable_mosaic.version = 11 : i64} {
  func.func @_fused_forward_kernel(%arg0: memref<8x16xf32, #tpu.memory_space<vmem>>, %arg1: memref<24x128xf32, #tpu.memory_space<vmem>>, %arg2: memref<8x128xf32, #tpu.memory_space<vmem>>) attributes {dimension_semantics = [], scalar_prefetch = 0 : i64, scratch_operands = 0 : i64, tpu.core_type = #tpu.core_type<tc>} {
    %c0 = arith.constant 0 : index
    %c0_0 = arith.constant 0 : index
    %0 = vector.load %arg1[%c0, %c0_0] : memref<24x128xf32, #tpu.memory_space<vmem>>, vector<16x16xf32>
    %c0_1 = arith.constant 0 : index
    %c16 = arith.constant 16 : index
    %1 = vector.load %arg1[%c0_1, %c16] : memref<24x128xf32, #tpu.memory_space<vmem>>, vector<16x32xf32>
    %c0_2 = arith.constant 0 : index
    %c52 = arith.constant 52 : index
    %2 = vector.load %arg1[%c0_2, %c52] : memref<24x128xf32, #tpu.memory_space<vmem>>, vector<1x16xf32>
    %c16_3 = arith.constant 16 : index
    %c0_4 = arith.constant 0 : index
    %3 = vector.load %arg1[%c16_3, %c0_4] : memref<24x128xf32, #tpu.memory_space<vmem>>, vector<8x8xf32>
    %c0_5 = arith.constant 0 : index
    %c0_6 = arith.constant 0 : index
    %4 = vector.load %arg0[%c0_5, %c0_6] : memref<8x16xf32, #tpu.memory_space<vmem>>, vector<8x16xf32>
    %cst = arith.constant dense<0.000000e+00> : vector<8x16xf32>
    %5 = tpu.matmul %4, %0, %cst {dimension_numbers = #tpu.dot_dimension_numbers<[1], [0], [0], [1], [0, 0, 1, 1], [], []>} : vector<8x16xf32>, vector<16x16xf32>, vector<8x16xf32> -> vector<8x16xf32>
    %cst_7 = arith.constant 0.000000e+00 : f32
    %6 = vector.broadcast %cst_7 : f32 to vector<8x16xf32>
    %7 = arith.maximumf %5, %6 : vector<8x16xf32>
    %cst_8 = arith.constant dense<0.000000e+00> : vector<8x32xf32>
    %8 = tpu.matmul %7, %1, %cst_8 {dimension_numbers = #tpu.dot_dimension_numbers<[1], [0], [0], [1], [0, 0, 1, 1], [], []>} : vector<8x16xf32>, vector<16x32xf32>, vector<8x32xf32> -> vector<8x32xf32>
    %9 = vector.extract_strided_slice %8 {offsets = [0, 0], sizes = [8, 16], strides = [1, 1]} : vector<8x32xf32> to vector<8x16xf32>
    %10 = vector.extract_strided_slice %8 {offsets = [0, 16], sizes = [8, 16], strides = [1, 1]} : vector<8x32xf32> to vector<8x16xf32>
    %11 = vector.shape_cast %10 : vector<8x16xf32> to vector<8x1x16xf32>
    %12 = vector.shape_cast %9 : vector<8x16xf32> to vector<1x8x16xf32>
    %13 = vector.broadcast %11 : vector<8x1x16xf32> to vector<8x8x16xf32>
    %14 = vector.broadcast %12 : vector<1x8x16xf32> to vector<8x8x16xf32>
    %15 = arith.addf %13, %14 : vector<8x8x16xf32>
    %cst_9 = arith.constant 0.000000e+00 : f32
    %16 = vector.broadcast %cst_9 : f32 to vector<8x8x16xf32>
    %17 = arith.cmpf ogt, %15, %16 : vector<8x8x16xf32>
    %cst_10 = arith.constant 2.000000e-01 : f32
    %18 = vector.broadcast %cst_10 : f32 to vector<8x8x16xf32>
    %19 = arith.mulf %18, %15 : vector<8x8x16xf32>
    %20 = arith.select %17, %15, %19 : vector<8x8x16xi1>, vector<8x8x16xf32>
    %21 = vector.shape_cast %2 : vector<1x16xf32> to vector<1x1x16xf32>
    %22 = vector.broadcast %21 : vector<1x1x16xf32> to vector<8x8x16xf32>
    %23 = arith.mulf %20, %22 : vector<8x8x16xf32>
    %cst_11 = arith.constant 0.000000e+00 : f32
    %24 = vector.broadcast %cst_11 : f32 to vector<8x4xf32>
    %25 = vector.extract_strided_slice %23 {offsets = [0, 0, 0], sizes = [8, 8, 8], strides = [1, 1, 1]} : vector<8x8x16xf32> to vector<8x8x8xf32>
    %cst_12 = arith.constant dense<0.000000e+00> : vector<8x8xf32>
    %26 = vector.multi_reduction <add>, %25, %cst_12 [2] : vector<8x8x8xf32> to vector<8x8xf32>
    %cst_13 = arith.constant dense<0xFF800000> : vector<8xf32>
    %27 = vector.multi_reduction <maximumf>, %26, %cst_13 [1] : vector<8x8xf32> to vector<8xf32>
    %28 = vector.shape_cast %27 : vector<8xf32> to vector<8x1xf32>
    %29 = vector.broadcast %28 : vector<8x1xf32> to vector<8x8xf32>
    %30 = arith.subf %26, %29 : vector<8x8xf32>
    %31 = math.exp %30 : vector<8x8xf32>
    %32 = arith.mulf %31, %3 : vector<8x8xf32>
    %cst_14 = arith.constant dense<0.000000e+00> : vector<8xf32>
    %33 = vector.multi_reduction <add>, %32, %cst_14 [1] : vector<8x8xf32> to vector<8xf32>
    %34 = vector.shape_cast %33 : vector<8xf32> to vector<8x1xf32>
    %35 = tpu.reciprocal %34 : vector<8x1xf32> -> vector<8x1xf32>
    %36 = vector.broadcast %35 : vector<8x1xf32> to vector<8x8xf32>
    %37 = arith.mulf %32, %36 : vector<8x8xf32>
    %38 = vector.extract_strided_slice %9 {offsets = [0, 0], sizes = [8, 8], strides = [1, 1]} : vector<8x16xf32> to vector<8x8xf32>
    %cst_15 = arith.constant dense<0.000000e+00> : vector<8x8xf32>
    %39 = tpu.matmul %37, %38, %cst_15 {dimension_numbers = #tpu.dot_dimension_numbers<[1], [0], [0], [1], [0, 0, 1, 1], [], []>} : vector<8x8xf32>, vector<8x8xf32>, vector<8x8xf32> -> vector<8x8xf32>
    %cst_16 = arith.constant 0.000000e+00 : f32
    %40 = vector.broadcast %cst_16 : f32 to vector<8x8xf32>
    %41 = arith.maximumf %39, %40 : vector<8x8xf32>
    %c0_17 = arith.constant 0 : index
    %c48 = arith.constant 48 : index
    %42 = vector.load %arg1[%c0_17, %c48] : memref<24x128xf32, #tpu.memory_space<vmem>>, vector<8x4xf32>
    %cst_18 = arith.constant dense<0.000000e+00> : vector<8x4xf32>
    %43 = tpu.matmul %41, %42, %cst_18 {dimension_numbers = #tpu.dot_dimension_numbers<[1], [0], [0], [1], [0, 0, 1, 1], [], []>} : vector<8x8xf32>, vector<8x4xf32>, vector<8x4xf32> -> vector<8x4xf32>
    %44 = arith.addf %24, %43 : vector<8x4xf32>
    %45 = vector.extract_strided_slice %23 {offsets = [0, 0, 8], sizes = [8, 8, 8], strides = [1, 1, 1]} : vector<8x8x16xf32> to vector<8x8x8xf32>
    %cst_19 = arith.constant dense<0.000000e+00> : vector<8x8xf32>
    %46 = vector.multi_reduction <add>, %45, %cst_19 [2] : vector<8x8x8xf32> to vector<8x8xf32>
    %cst_20 = arith.constant dense<0xFF800000> : vector<8xf32>
    %47 = vector.multi_reduction <maximumf>, %46, %cst_20 [1] : vector<8x8xf32> to vector<8xf32>
    %48 = vector.shape_cast %47 : vector<8xf32> to vector<8x1xf32>
    %49 = vector.broadcast %48 : vector<8x1xf32> to vector<8x8xf32>
    %50 = arith.subf %46, %49 : vector<8x8xf32>
    %51 = math.exp %50 : vector<8x8xf32>
    %52 = arith.mulf %51, %3 : vector<8x8xf32>
    %cst_21 = arith.constant dense<0.000000e+00> : vector<8xf32>
    %53 = vector.multi_reduction <add>, %52, %cst_21 [1] : vector<8x8xf32> to vector<8xf32>
    %54 = vector.shape_cast %53 : vector<8xf32> to vector<8x1xf32>
    %55 = tpu.reciprocal %54 : vector<8x1xf32> -> vector<8x1xf32>
    %56 = vector.broadcast %55 : vector<8x1xf32> to vector<8x8xf32>
    %57 = arith.mulf %52, %56 : vector<8x8xf32>
    %58 = vector.extract_strided_slice %9 {offsets = [0, 8], sizes = [8, 8], strides = [1, 1]} : vector<8x16xf32> to vector<8x8xf32>
    %cst_22 = arith.constant dense<0.000000e+00> : vector<8x8xf32>
    %59 = tpu.matmul %57, %58, %cst_22 {dimension_numbers = #tpu.dot_dimension_numbers<[1], [0], [0], [1], [0, 0, 1, 1], [], []>} : vector<8x8xf32>, vector<8x8xf32>, vector<8x8xf32> -> vector<8x8xf32>
    %cst_23 = arith.constant 0.000000e+00 : f32
    %60 = vector.broadcast %cst_23 : f32 to vector<8x8xf32>
    %61 = arith.maximumf %59, %60 : vector<8x8xf32>
    %c8 = arith.constant 8 : index
    %c48_24 = arith.constant 48 : index
    %62 = vector.load %arg1[%c8, %c48_24] : memref<24x128xf32, #tpu.memory_space<vmem>>, vector<8x4xf32>
    %cst_25 = arith.constant dense<0.000000e+00> : vector<8x4xf32>
    %63 = tpu.matmul %61, %62, %cst_25 {dimension_numbers = #tpu.dot_dimension_numbers<[1], [0], [0], [1], [0, 0, 1, 1], [], []>} : vector<8x8xf32>, vector<8x4xf32>, vector<8x4xf32> -> vector<8x4xf32>
    %64 = arith.addf %44, %63 : vector<8x4xf32>
    %cst_26 = arith.constant 0.000000e+00 : f32
    %65 = vector.broadcast %cst_26 : f32 to vector<8x108xf32>
    %66 = tpu.concatenate %64, %37, %57, %65 in 1 : vector<8x4xf32>, vector<8x8xf32>, vector<8x8xf32>, vector<8x108xf32> -> vector<8x128xf32>
    %c0_27 = arith.constant 0 : index
    %c0_28 = arith.constant 0 : index
    %67 = vector.load %arg2[%c0_27, %c0_28] : memref<8x128xf32, #tpu.memory_space<vmem>>, vector<8x128xf32>
    tpu.vector_store %arg2[%c0_27, %c0_28], %66 {strides = array<i32>} : memref<8x128xf32, #tpu.memory_space<vmem>>, vector<8x128xf32>,
    return
  }
}

</mosaic_0001>

<bundles_post_ra>
// kernel: tpu_custom_call.1
= control target key start
LH: loop header
LB: loop body
LE: loop exit
PB: predicated region body
PF: predicated region fallthrough
CT: control target
= control target key end

     0   :  { %7 = vsyncpa [#allocation3], 0  ;;  %s2227_s0 = inlined_call_operand.hbm [shape: f32[8,16], index: 0, kind: input, shape index: {}]   ;;  %s2228_s1 = inlined_call_operand.hbm [shape: f32[24,128], index: 1, kind: input, shape index: {}]   ;;  %s2229_s2 = inlined_call_operand.hbm [shape: f32[8,128], index: 2, kind: output, shape index: {}]  }
   0x1   :  { %8 = vsyncpa [#allocation6], 0 }
   0x2   :  { %9 = vsyncpa [#allocation4], 0  ;;  %s1743_s9 = smov [#allocation2]   ;;  %s1744_s11 = smov [#allocation5]  }
   0x3   :  { %s16_s10 = sshll.u32 %s1743_s9, 4  ;;  %s25_s12 = sshll.u32 %s1744_s11, 4  ;;  %s17_s10 = int_to_ptr.vmem [resolvable:$true] %s16_s10  ;;  %s26_s12 = int_to_ptr.vmem [resolvable:$true] %s25_s12 }
   0x4   :  { %s1685_s13 = scalar_lea.vmem %s17_s10, 128  ;;  %p1690_p1 = scmp.lt.s32.totalorder %s17_s10, %s17_s10 }
   0x5   :  { %p1686_p0 = scmp.ne.s32.totalorder %s17_s10, %s1685_s13  ;;  %p1691_p2 = scmp.lt.s32.totalorder %s1685_s13, %s1685_s13 }
   0x7   :  { %p1692_p3 = por %p1691_p2, %p1690_p1 }
   0x9   :  { %p1693_p4 = pnand %p1692_p3, %p1686_p0 }
   0xb   :  { %1696 = shalt.err (!%p1693_p4)
}
   0xc   :  { %19 = dma.hbm_to_vmem [thread:$0]  %s2227_s0, 128, %s17_s10, [#allocation3]  }
   0xd   :  { %s1705_s16 = scalar_lea.vmem %s26_s12, 384  ;;  %p1710_p6 = scmp.lt.s32.totalorder %s26_s12, %s26_s12 }
   0xe   :  { %p1706_p5 = scmp.ne.s32.totalorder %s26_s12, %s1705_s16  ;;  %p1711_p7 = scmp.lt.s32.totalorder %s1705_s16, %s1705_s16 }
  0x10   :  { %p1712_p8 = por %p1711_p7, %p1710_p6 }
  0x12   :  { %p1713_p9 = pnand %p1712_p8, %p1706_p5 }
  0x14   :  { %1716 = shalt.err (!%p1713_p9)
}
  0x15   :  { %s1745_s17 = smov 128   ;;  %s1746_s18 = smov 8  }
  0x16   :  { %31 = dma.hbm_to_vmem [thread:$0]  %s2228_s1, 384, %s26_s12, [#allocation6], %s1745_s17, %s1745_s17, %s1746_s18  }
  0x17   :  { %1737 = dma.done.wait [#allocation3], 128  }
  0x18   :  { %1738 = vsyncadd [#allocation3], 4294967168 }
  0x19   :  { %1739 = dma.done.wait [#allocation6], 384  }
  0x1a   :  { %1740 = vsyncadd [#allocation6], 4294966912  ;;  %v1747_v0 = vmov 0.0   ;;  %vm1748_vm0 = vmmov 0   ;;  %v39_v1 = vld [vmem:[#allocation5 + $0x8] sm:$0xff]  ;;  %v38_v2 = vld [vmem:[#allocation5] sm:$0xff]  ;;  %v204_v14 = vlaneseq }
  0x1b   :  { %1590 = vmatprep.subr.mxu0 %v1747_v0  ;;  %1594 = vmatprep.mubr.msk.f32.mxu0 %vm1748_vm0, %v1747_v0  ;;  %v42_v3 = vld [vmem:[#allocation2] sm:$0xff]  ;;  %vm43_vm1 = vcmask 130048   ;;  %s1749_s0 = smov 112   ;;  %s1750_s1 = smov 16   ;;  %v1571_v11 = vld [vmem:[#allocation5] ss:$0 sm:$0xff] }
  0x1c   :  { %1597 = vmatprep.subr.mxu1 %v1747_v0  ;;  %1601 = vmatprep.mubr.msk.f32.mxu1 %vm1748_vm0, %v1747_v0  ;;  %s1751_s21 = smov 92   ;;  %v1752_v12 = vmov 1966171168   ;;  %v1803_v16 = vshrl.u32 %v204_v14, 7  ;;  %s1753_s22 = smov 104   ;;  %vm372_vm10 = vcmask 64512  }
  0x1d   :  { %1591 = vmatpush3.msra.mxu0 %v39_v1  ;;  %122 = vrot.lane.b32.xlu0 %v39_v1, %s1749_s0  ;;  %v202_v13 = vunpack.c.l.s4 %v1752_v12  ;;  %vm439_vm11 = vcmask 1041409   ;;  %vm441_vm12 = vcmask 1042434   ;;  %vm443_vm13 = vcmask 1043459   ;;  %s1755_s23 = smov 120   ;;  %s1756_s24 = smov 80  }
  0x1e   :  { %1592 = vmatprep.subr.mxu0 %v1747_v0  ;;  %v1808_v22 = vsub.s32 0, %v1803_v16  ;;  %vm445_vm14 = vcmask 1044484   ;;  %vm447_vm15 = vcmask 1045509   ;;  %s1757_s25 = smov [#allocation7]  }
  0x1f   :  { %1593 = vmatpush3.msra.mxu0 %v38_v2  ;;  %v203_v15 = vunpack.c.0.s8 %v202_v13  ;;  %s1559_s26 = sshll.u32 %s1757_s25, 4  ;;  %s1560_s26 = int_to_ptr.vmem [resolvable:$true] %s1559_s26 }
  0x20   :  { %1595 = vmatmul.mubr.msk.f32.vlgmr.msra.gmra.mxu0 %vm43_vm1, %v42_v3  ;;  %1604 = vmatprep.subr.mxu0 %v1747_v0  ;;  %s1717_s27 = scalar_lea.vmem %s1560_s26, 128  ;;  %p1722_p11 = scmp.lt.s32.totalorder %s1560_s26, %s1560_s26 }
  0x21   :  { %120 = vrot.lane.b32.xlu0 %v38_v2, %s1749_s0  ;;  %1606 = vmatprep.mubr.msk.f32.mxu0 %vm1748_vm0, %v1747_v0  ;;  %v206_v17 = vsub.s32 %v203_v15, %v1803_v16  ;;  %p1718_p10 = scmp.ne.s32.totalorder %s1560_s26, %s1717_s27  ;;  %p1723_p12 = scmp.lt.s32.totalorder %s1717_s27, %s1717_s27 }
  0x23   :  { %p1724_p13 = por %p1723_p12, %p1722_p11 }
  0x25   :  { %p1725_p0 = pnand %p1724_p13, %p1718_p10 }
  0x8f   :  { %v123_v4 = vpop.permute.xlu0 %122 }
  0x90   :  { %1598 = vmatpush3.msra.mxu1 %v123_v4 }
  0x91   :  { %1599 = vmatprep.subr.mxu1 %v1747_v0 }
  0x93   :  { %v121_v5 = vpop.permute.xlu0 %120 }
  0x94   :  { %1600 = vmatpush3.msra.mxu1 %v121_v5 }
  0x95   :  { %1609 = vmatprep.subr.mxu1 %v1747_v0 }
  0xe0   :  { %v113_v6 = vpop.f32.mrf.mxu0 }
  0xe1   :  { %v117_v7 = vmax.f32 %v113_v6, 0.0 }
  0xe2   :  { %v1596_v8 = vpop.f32.mrf.mxu0 }
  0xe3   :  { %1602 = vmatmul.mubr.msk.f32.vlgmr.msra.gmra.mxu1 %vm43_vm1, %v117_v7  ;;  %vm449_vm1 = vcmask 1046534  }
  0xe4   :  { %1611 = vmatprep.mubr.msk.f32.mxu1 %vm1748_vm0, %v1747_v0 }
 0x1a3   :  { %v1797_v9 = vpop.f32.mrf.mxu1 }
 0x1a4   :  { %289 = vrot.lane.b32.xlu1 %v1797_v9, %s1750_s1  ;;  %1605 = vmatpush3.msra.mxu0 %v1797_v9  ;;  %v207_v18 = vrot.slane %v1797_v9, %v206_v17  ;;  %v200_v23 = vcombine.high %v1797_v9, %v1797_v9 }
 0x1a5   :  { %v1603_v10 = vpop.f32.mrf.mxu1  ;;  %1614 = vmatprep.subr.mxu0 %v1747_v0 }
 0x1a6   :  { %v215_v19 = vcombine.high %v207_v18, %v207_v18  ;;  %v223_v20 = vrot.slane %v207_v18, %v206_v17  ;;  %v214_v27 = vrot.slane %v200_v23, %v206_v17 }
 0x1a8   :  { %329 = vrot.lane.b32.xlu1 %v1571_v11, %s1751_s21  ;;  %v237_v21 = vrot.slane %v215_v19, %v206_v17  ;;  %v245_v24 = vcombine.high %v223_v20, %v223_v20  ;;  %v252_v25 = vrot.slane %v223_v20, %v1808_v22  ;;  %v216_v36 = vcombine.high %v214_v27, %v214_v27 }
 0x1a9   :  { %v230_v38 = vrot.slane %v214_v27, %v206_v17 }
 0x1aa   :  { %v256_v26 = vrot.slane %v237_v21, %v1808_v22  ;;  %v260_v29 = vrot.slane %v245_v24, %v1808_v22  ;;  %v247_v32 = vcombine.high %v237_v21, %v237_v21  ;;  %v244_v47 = vrot.slane %v216_v36, %v206_v17 }
 0x1ab   :  { %v268_v46 = vrot.slane %v230_v38, %v1808_v22  ;;  %v246_v52 = vcombine.high %v230_v38, %v230_v38 }
 0x1ac   :  { %v264_v41 = vrot.slane %v247_v32, %v1808_v22  ;;  %v272_v51 = vrot.slane %v244_v47, %v1808_v22  ;;  %v248_v58 = vcombine.high %v244_v47, %v244_v47  ;;  %v1852_v47 = vld [vmem:[#allocation5 + $0x10] sm:$0xff] }
 0x1ad   :  { %v276_v57 = vrot.slane %v246_v52, %v1808_v22 }
 0x1ae   :  { %v280_v63 = vrot.slane %v248_v58, %v1808_v22 }
 0x216   :  { %v290_v28 = vpop.permute.xlu1 %289 }
 0x217   :  { %v292_v30 = vadd.f32 %v290_v28, %v252_v25  ;;  %v293_v31 = vadd.f32 %v290_v28, %v256_v26  ;;  %v294_v33 = vadd.f32 %v290_v28, %v260_v29  ;;  %v295_v45 = vadd.f32 %v290_v28, %v264_v41 }
 0x218   :  { %v296_v50 = vadd.f32 %v290_v28, %v268_v46  ;;  %v297_v56 = vadd.f32 %v290_v28, %v272_v51  ;;  %v298_v62 = vadd.f32 %v290_v28, %v276_v57  ;;  %v299_v4 = vadd.f32 %v290_v28, %v280_v63 }
 0x219   :  { %vm300_vm2 = vcmp.gt.f32.partialorder %v292_v30, 0.0  ;;  %v308_v34 = vmul.f32 0.2, %v292_v30  ;;  %vm301_vm3 = vcmp.gt.f32.partialorder %v293_v31, 0.0  ;;  %v309_v35 = vmul.f32 0.2, %v293_v31 }
 0x21a   :  { %v330_v37 = vpop.permute.xlu1 %329  ;;  %v310_v44 = vmul.f32 0.2, %v294_v33  ;;  %vm302_vm4 = vcmp.gt.f32.partialorder %v294_v33, 0.0  ;;  %v311_v49 = vmul.f32 0.2, %v295_v45  ;;  %vm303_vm5 = vcmp.gt.f32.partialorder %v295_v45, 0.0 }
 0x21b   :  { %v316_v39 = vsel %vm300_vm2, %v292_v30, %v308_v34  ;;  %v317_v40 = vsel %vm301_vm3, %v293_v31, %v309_v35  ;;  %v312_v55 = vmul.f32 0.2, %v296_v50  ;;  %vm304_vm6 = vcmp.gt.f32.partialorder %v296_v50, 0.0 }
 0x21c   :  { %v332_v42 = vmul.f32 %v330_v37, %v316_v39  ;;  %v333_v43 = vmul.f32 %v330_v37, %v317_v40  ;;  %v318_v48 = vsel %vm302_vm4, %v294_v33, %v310_v44  ;;  %v319_v54 = vsel %vm303_vm5, %v295_v45, %v311_v49 }
 0x21d   :  { %v334_v53 = vmul.f32 %v330_v37, %v318_v48  ;;  %v335_v59 = vmul.f32 %v330_v37, %v319_v54  ;;  %v320_v60 = vsel %vm304_vm6, %v296_v50, %v312_v55  ;;  %v313_v61 = vmul.f32 0.2, %v297_v56 }
 0x21e   :  { %348 = vrot.lane.b32.xlu0 %v332_v42, %s1749_s0  ;;  %350 = vrot.lane.b32.xlu1 %v333_v43, %s1749_s0  ;;  %vm305_vm7 = vcmp.gt.f32.partialorder %v297_v56, 0.0  ;;  %v336_v1 = vmul.f32 %v330_v37, %v320_v60  ;;  %v314_v3 = vmul.f32 0.2, %v298_v62  ;;  %vm306_vm8 = vcmp.gt.f32.partialorder %v298_v62, 0.0 }
 0x21f   :  { %v321_v2 = vsel %vm305_vm7, %v297_v56, %v313_v61  ;;  %v315_v7 = vmul.f32 0.2, %v299_v4  ;;  %vm307_vm9 = vcmp.gt.f32.partialorder %v299_v4, 0.0  ;;  %v526_v48 = vrot.slane %v1852_v47, %v1808_v22 }
 0x220   :  { %v337_v5 = vmul.f32 %v330_v37, %v321_v2  ;;  %v322_v6 = vsel %vm306_vm8, %v298_v62, %v314_v3  ;;  %v1871_v56 = vand.u32 127, %v204_v14  ;;  %vm451_vm2 = vcmask 1047559  }
 0x221   :  { %v338_v8 = vmul.f32 %v330_v37, %v322_v6  ;;  %v323_v10 = vsel %vm307_vm9, %v299_v4, %v315_v7  ;;  %vm1546_vm3 = vcmask 31744   ;;  %vm1550_vm4 = vcmask 162816  }
 0x222   :  { %865 = vrot.lane.b32.xlu0 %v332_v42, %s1753_s22  ;;  %867 = vrot.lane.b32.xlu1 %v333_v43, %s1753_s22  ;;  %v339_v11 = vmul.f32 %v330_v37, %v323_v10 }
 0x226   :  { %352 = vrot.lane.b32.xlu0 %v334_v53, %s1749_s0  ;;  %869 = vrot.lane.b32.xlu1 %v334_v53, %s1753_s22 }
 0x22a   :  { %871 = vrot.lane.b32.xlu1 %v335_v59, %s1753_s22  ;;  %354 = vrot.lane.b32.xlu0 %v335_v59, %s1749_s0  ;;  %v1879_v59 = vsub.s32 %v1871_v56, %v1803_v16 }
 0x22e   :  { %873 = vrot.lane.b32.xlu1 %v336_v1, %s1753_s22  ;;  %356 = vrot.lane.b32.xlu0 %v336_v1, %s1749_s0 }
 0x232   :  { %875 = vrot.lane.b32.xlu1 %v337_v5, %s1753_s22  ;;  %358 = vrot.lane.b32.xlu0 %v337_v5, %s1749_s0 }
 0x236   :  { %877 = vrot.lane.b32.xlu1 %v338_v8, %s1753_s22  ;;  %360 = vrot.lane.b32.xlu0 %v338_v8, %s1749_s0 }
 0x23a   :  { %879 = vrot.lane.b32.xlu1 %v339_v11, %s1753_s22  ;;  %362 = vrot.lane.b32.xlu0 %v339_v11, %s1749_s0 }
 0x290   :  { %v349_v12 = vpop.permute.xlu0 %348  ;;  %v351_v13 = vpop.permute.xlu1 %350 }
 0x291   :  { %v376_v15 = vsel %vm372_vm10, %v351_v13, 0.0  ;;  %v373_v17 = vsel %vm372_vm10, %v349_v12, 0.0 }
 0x292   :  { %377 = vadd.xlane.f32.xlu1 %v376_v15  ;;  %374 = vadd.xlane.f32.xlu0 %v373_v17 }
 0x294   :  { %v866_v18 = vpop.permute.xlu0 %865  ;;  %v868_v19 = vpop.permute.xlu1 %867 }
 0x295   :  { %v889_v20 = vsel %vm372_vm10, %v866_v18, 0.0  ;;  %v892_v25 = vsel %vm372_vm10, %v868_v19, 0.0 }
 0x296   :  { %890 = vadd.xlane.f32.xlu0 %v889_v20 }
 0x298   :  { %v353_v21 = vpop.permute.xlu0 %352  ;;  %v870_v23 = vpop.permute.xlu1 %869 }
 0x299   :  { %v379_v24 = vsel %vm372_vm10, %v353_v21, 0.0  ;;  %v895_v29 = vsel %vm372_vm10, %v870_v23, 0.0 }
 0x29a   :  { %380 = vadd.xlane.f32.xlu1 %v379_v24  ;;  %893 = vadd.xlane.f32.xlu0 %v892_v25 }
 0x29c   :  { %v872_v26 = vpop.permute.xlu1 %871  ;;  %v355_v27 = vpop.permute.xlu0 %354 }
 0x29d   :  { %v382_v28 = vsel %vm372_vm10, %v355_v27, 0.0  ;;  %v898_v33 = vsel %vm372_vm10, %v872_v26, 0.0 }
 0x29e   :  { %383 = vadd.xlane.f32.xlu1 %v382_v28  ;;  %896 = vadd.xlane.f32.xlu0 %v895_v29 }
 0x2a0   :  { %v874_v30 = vpop.permute.xlu1 %873  ;;  %v357_v31 = vpop.permute.xlu0 %356 }
 0x2a1   :  { %v385_v32 = vsel %vm372_vm10, %v357_v31, 0.0  ;;  %v901_v37 = vsel %vm372_vm10, %v874_v30, 0.0 }
 0x2a2   :  { %386 = vadd.xlane.f32.xlu1 %v385_v32  ;;  %899 = vadd.xlane.f32.xlu0 %v898_v33 }
 0x2a4   :  { %v876_v34 = vpop.permute.xlu1 %875  ;;  %v359_v35 = vpop.permute.xlu0 %358 }
 0x2a5   :  { %v388_v36 = vsel %vm372_vm10, %v359_v35, 0.0  ;;  %v904_v41 = vsel %vm372_vm10, %v876_v34, 0.0 }
 0x2a6   :  { %389 = vadd.xlane.f32.xlu1 %v388_v36  ;;  %902 = vadd.xlane.f32.xlu0 %v901_v37 }
 0x2a8   :  { %v878_v38 = vpop.permute.xlu1 %877  ;;  %v361_v39 = vpop.permute.xlu0 %360 }
 0x2a9   :  { %v391_v40 = vsel %vm372_vm10, %v361_v39, 0.0  ;;  %v907_v43 = vsel %vm372_vm10, %v878_v38, 0.0  ;;  %v1944_v39 = vsub.s32 2, %v1803_v16 }
 0x2aa   :  { %392 = vadd.xlane.f32.xlu1 %v391_v40  ;;  %905 = vadd.xlane.f32.xlu0 %v904_v41  ;;  %v1949_v41 = vsub.s32 3, %v1803_v16 }
 0x2ab   :  { %v540_v40 = vrot.slane %v1852_v47, %v1944_v39 }
 0x2ac   :  { %v363_v42 = vpop.permute.xlu0 %362  ;;  %v880_v45 = vpop.permute.xlu1 %879 }
 0x2ad   :  { %v394_v44 = vsel %vm372_vm10, %v363_v42, 0.0  ;;  %v910_v46 = vsel %vm372_vm10, %v880_v45, 0.0  ;;  %v547_v42 = vrot.slane %v1852_v47, %v1949_v41 }
 0x2ae   :  { %908 = vadd.xlane.f32.xlu0 %v907_v43  ;;  %395 = vadd.xlane.f32.xlu1 %v394_v44  ;;  %v1954_v43 = vsub.s32 5, %v1803_v16  ;;  %v1957_v44 = vsub.s32 1, %v1803_v16 }
 0x2b0   :  { %v561_v45 = vrot.slane %v1852_v47, %v1954_v43 }
 0x2b2   :  { %911 = vadd.xlane.f32.xlu0 %v910_v46  ;;  %v1962_v46 = vsub.s32 7, %v1803_v16 }
 0x2bf   :  { %528 = vbcast.lane.b32.xlu1 %v526_v48, 256  ;;  %v533_v48 = vrot.slane %v1852_v47, %v1957_v44 }
 0x31b   :  { %v1856_v49 = vpop.xlane.xlu0 %374  ;;  %v1858_v50 = vpop.xlane.xlu1 %377 }
 0x31c   :  { %v414_v62 = vrot.slane %v1858_v50, %v1879_v59  ;;  %v410_v63 = vrot.slane %v1856_v49, %v1879_v59 }
 0x31e   :  { %v440_v5 = vsel %vm439_vm11, %v414_v62, %v410_v63  ;;  %v1967_v62 = vsub.s32 4, %v1803_v16  ;;  %v575_v63 = vrot.slane %v1852_v47, %v1962_v46 }
 0x31f   :  { %v1860_v51 = vpop.xlane.xlu0 %890 }
 0x320   :  { %v924_v12 = vrot.slane %v1860_v51, %v1879_v59 }
 0x323   :  { %v1862_v52 = vpop.xlane.xlu1 %380  ;;  %v1864_v53 = vpop.xlane.xlu0 %893 }
 0x324   :  { %v418_v14 = vrot.slane %v1862_v52, %v1879_v59  ;;  %v928_v6 = vrot.slane %v1864_v53, %v1879_v59 }
 0x326   :  { %v442_v8 = vsel %vm441_vm12, %v418_v14, %v440_v5  ;;  %v953_v21 = vsel %vm439_vm11, %v928_v6, %v924_v12  ;;  %v554_v14 = vrot.slane %v1852_v47, %v1967_v62  ;;  %v1754_v5 = vmov 0  }
 0x327   :  { %v1866_v54 = vpop.xlane.xlu1 %383  ;;  %v1868_v55 = vpop.xlane.xlu0 %896  ;;  %1640 = vset.pattern.permute.xlu1 %v1754_v5  ;;  %1639 = vset.pattern.permute.xlu0 %v1754_v5 }
 0x328   :  { %v422_v1 = vrot.slane %v1866_v54, %v1879_v59  ;;  %v932_v10 = vrot.slane %v1868_v55, %v1879_v59 }
 0x32a   :  { %v444_v13 = vsel %vm443_vm13, %v422_v1, %v442_v8  ;;  %v954_v26 = vsel %vm441_vm12, %v932_v10, %v953_v21  ;;  %v1974_v1 = vsub.s32 6, %v1803_v16 }
 0x32b   :  { %v1873_v57 = vpop.xlane.xlu1 %386  ;;  %v1875_v58 = vpop.xlane.xlu0 %899 }
 0x32c   :  { %v426_v2 = vrot.slane %v1873_v57, %v1879_v59  ;;  %v936_v15 = vrot.slane %v1875_v58, %v1879_v59 }
 0x32e   :  { %v446_v17 = vsel %vm445_vm14, %v426_v2, %v444_v13  ;;  %v955_v29 = vsel %vm443_vm13, %v936_v15, %v954_v26  ;;  %v568_v2 = vrot.slane %v1852_v47, %v1974_v1 }
 0x32f   :  { %v1881_v60 = vpop.xlane.xlu1 %389  ;;  %v1883_v61 = vpop.xlane.xlu0 %902 }
 0x330   :  { %v430_v7 = vrot.slane %v1881_v60, %v1879_v59  ;;  %v940_v18 = vrot.slane %v1883_v61, %v1879_v59 }
 0x332   :  { %v448_v25 = vsel %vm447_vm15, %v430_v7, %v446_v17  ;;  %v956_v31 = vsel %vm445_vm14, %v940_v18, %v955_v29 }
 0x333   :  { %v1895_v3 = vpop.xlane.xlu1 %392  ;;  %v1897_v4 = vpop.xlane.xlu0 %905 }
 0x334   :  { %v434_v11 = vrot.slane %v1895_v3, %v1879_v59  ;;  %v944_v23 = vrot.slane %v1897_v4, %v1879_v59 }
 0x336   :  { %v450_v28 = vsel %vm449_vm1, %v434_v11, %v448_v25  ;;  %v957_v35 = vsel %vm447_vm15, %v944_v23, %v956_v31 }
 0x337   :  { %v1917_v19 = vpop.xlane.xlu1 %395  ;;  %v1919_v20 = vpop.xlane.xlu0 %908 }
 0x338   :  { %v438_v24 = vrot.slane %v1917_v19, %v1879_v59  ;;  %v948_v27 = vrot.slane %v1919_v20, %v1879_v59 }
 0x33a   :  { %v452_v30 = vsel %vm451_vm2, %v438_v24, %v450_v28  ;;  %v958_v36 = vsel %vm449_vm1, %v948_v27, %v957_v35 }
 0x33b   :  { %v1934_v32 = vpop.xlane.xlu0 %911  ;;  %v454_v33 = vsel %vm372_vm10, %v452_v30, -inf  ;;  %v1978_v6 = vpop.permute.xlu1 %528 }
 0x33c   :  { %v952_v34 = vrot.slane %v1934_v32, %v1879_v59  ;;  %455 = vmax.xlane.f32.xlu1 %v454_v33 }
 0x33e   :  { %v959_v37 = vsel %vm451_vm2, %v952_v34, %v958_v36 }
 0x33f   :  { %v961_v38 = vsel %vm372_vm10, %v959_v37, -inf }
 0x340   :  { %962 = vmax.xlane.f32.xlu0 %v961_v38 }
 0x34d   :  { %542 = vbcast.lane.b32.xlu1 %v540_v40, 256 }
 0x351   :  { %549 = vbcast.lane.b32.xlu1 %v547_v42, 256 }
 0x355   :  { %563 = vbcast.lane.b32.xlu1 %v561_v45, 256 }
 0x356   :  { %535 = vbcast.lane.b32.xlu0 %v533_v48, 256 }
 0x359   :  { %577 = vbcast.lane.b32.xlu1 %v575_v63, 256 }
 0x35a   :  { %556 = vbcast.lane.b32.xlu0 %v554_v14, 256 }
 0x35e   :  { %570 = vbcast.lane.b32.xlu0 %v568_v2, 256 }
 0x3c5   :  { %v1980_v7 = vpop.xlane.xlu1 %455 }
 0x3c6   :  { %v465_v8 = vrot.slane %v1980_v7, %v1957_v44  ;;  %v461_v47 = vrot.slane %v1980_v7, %v1808_v22  ;;  %v469_v17 = vrot.slane %v1980_v7, %v1944_v39  ;;  %v473_v25 = vrot.slane %v1980_v7, %v1949_v41 }
 0x3c7   :  { %v485_v48 = vrot.slane %v1980_v7, %v1974_v1  ;;  %v489_v5 = vrot.slane %v1980_v7, %v1962_v46 }
 0x3c8   :  { %v499_v10 = vsub.f32 %v1858_v50, %v465_v8  ;;  %v498_v50 = vsub.f32 %v1856_v49, %v461_v47  ;;  %v500_v24 = vsub.f32 %v1862_v52, %v469_v17  ;;  %v501_v49 = vsub.f32 %v1866_v54, %v473_v25 }
 0x3c9   :  { %v1985_v11 = vpop.xlane.xlu0 %962  ;;  %v481_v54 = vrot.slane %v1980_v7, %v1954_v43 }
 0x3ca   :  { %v508_v12 = vmul.f32 1.442695, %v499_v10  ;;  %v972_v13 = vrot.slane %v1985_v11, %v1957_v44  ;;  %v968_v15 = vrot.slane %v1985_v11, %v1808_v22  ;;  %v976_v23 = vrot.slane %v1985_v11, %v1944_v39 }
 0x3cb   :  { %v506_v27 = vmul.f32 1.442695, %v498_v50  ;;  %v510_v30 = vmul.f32 1.442695, %v500_v24  ;;  %v512_v36 = vmul.f32 1.442695, %v501_v49  ;;  %v988_v38 = vrot.slane %v1985_v11, %v1954_v43 }
 0x3cc   :  { %1641 = vpow2.f32 %v508_v12  ;;  %v1006_v18 = vsub.f32 %v1864_v53, %v972_v13  ;;  %v1005_v21 = vsub.f32 %v1860_v51, %v968_v15  ;;  %v1007_v29 = vsub.f32 %v1868_v55, %v976_v23 }
 0x3cd   :  { %v980_v53 = vrot.slane %v1985_v11, %v1949_v41  ;;  %v477_v51 = vrot.slane %v1980_v7, %v1967_v62  ;;  %v536_v31 = vpop.permute.xlu0 %535  ;;  %v984_v55 = vrot.slane %v1985_v11, %v1967_v62  ;;  %v503_v42 = vsub.f32 %v1881_v60, %v481_v54 }
 0x3ce   :  { %v1015_v26 = vmul.f32 1.442695, %v1006_v18  ;;  %v1013_v28 = vmul.f32 1.442695, %v1005_v21  ;;  %v1017_v33 = vmul.f32 1.442695, %v1007_v29  ;;  %v1010_v63 = vsub.f32 %v1897_v4, %v988_v38  ;;  %v543_v18 = vpop.permute.xlu1 %542 }
 0x3cf   :  { %v1008_v34 = vsub.f32 %v1875_v58, %v980_v53  ;;  %v502_v37 = vsub.f32 %v1873_v57, %v477_v51  ;;  %v1009_v58 = vsub.f32 %v1883_v61, %v984_v55  ;;  %v992_v14 = vrot.slane %v1985_v11, %v1974_v1 }
 0x3d0   :  { %1643 = vpow2.f32 %v1015_v26  ;;  %v516_v2 = vmul.f32 1.442695, %v503_v42  ;;  %v504_v61 = vsub.f32 %v1895_v3, %v485_v48  ;;  %v1023_v10 = vmul.f32 1.442695, %v1010_v63 }
 0x3d1   :  { %1645 = vpow2.f32 %v506_v27  ;;  %v1019_v40 = vmul.f32 1.442695, %v1008_v34  ;;  %v514_v45 = vmul.f32 1.442695, %v502_v37  ;;  %v1021_v57 = vmul.f32 1.442695, %v1009_v58  ;;  %v557_v53 = vpop.permute.xlu0 %556 }
 0x3d2   :  { %1647 = vpow2.f32 %v1013_v28  ;;  %v996_v4 = vrot.slane %v1985_v11, %v1962_v46  ;;  %v1011_v13 = vsub.f32 %v1919_v20, %v992_v14  ;;  %v505_v15 = vsub.f32 %v1917_v19, %v489_v5  ;;  %v550_v25 = vpop.permute.xlu1 %549 }
 0x3d3   :  { %1649 = vpow2.f32 %v510_v30  ;;  %v518_v17 = vmul.f32 1.442695, %v504_v61 }
 0x3d4   :  { %1651 = vpow2.f32 %v1017_v33  ;;  %v1012_v20 = vsub.f32 %v1934_v32, %v996_v4  ;;  %v1025_v11 = vmul.f32 1.442695, %v1011_v13  ;;  %v520_v19 = vmul.f32 1.442695, %v505_v15 }
 0x3d5   :  { %1653 = vpow2.f32 %v512_v36  ;;  %v571_v36 = vpop.permute.xlu0 %570 }
 0x3d6   :  { %1655 = vpow2.f32 %v1019_v40  ;;  %v1027_v26 = vmul.f32 1.442695, %v1012_v20 }
 0x3d7   :  { %1657 = vpow2.f32 %v514_v45 }
 0x3d8   :  { %1659 = vpow2.f32 %v1021_v57 }
 0x3d9   :  { %v1642_v52 = vpop.eup %1641  ;;  %1661 = vpow2.f32 %v516_v2 }
 0x3da   :  { %v2010_v35 = vmul.f32 %v1642_v52, %v536_v31  ;;  %1663 = vpow2.f32 %v1023_v10  ;;  %v564_v52 = vpop.permute.xlu1 %563 }
 0x3db   :  { %1665 = vpow2.f32 %v518_v17 }
 0x3dc   :  { %607 = vperm.xlu1 %1640, %v2010_v35   ;;  %1667 = vpow2.f32 %v1025_v11 }
 0x3dd   :  { %v1644_v8 = vpop.eup %1643  ;;  %1669 = vpow2.f32 %v520_v19 }
 0x3de   :  { %v1646_v60 = vpop.eup %1645  ;;  %v2040_v50 = vmul.f32 %v1644_v8, %v536_v31  ;;  %1671 = vpow2.f32 %v1027_v26  ;;  %v578_v58 = vpop.permute.xlu1 %577 }
 0x3df   :  { %v1648_v12 = vpop.eup %1647  ;;  %v2034_v47 = vmul.f32 %v1646_v60, %v1978_v6 }
 0x3e0   :  { %v2038_v7 = vmul.f32 %v1648_v12, %v1978_v6  ;;  %v1650_v3 = vpop.eup %1649 }
 0x3e1   :  { %604 = vperm.xlu0 %1639, %v2034_v47   ;;  %v1652_v21 = vpop.eup %1651  ;;  %v2045_v23 = vmul.f32 %v1650_v3, %v543_v18 }
 0x3e2   :  { %1046 = vperm.xlu1 %1640, %v2038_v7   ;;  %v1654_v24 = vpop.eup %1653  ;;  %v2049_v6 = vmul.f32 %v1652_v21, %v543_v18 }
 0x3e3   :  { %v1656_v27 = vpop.eup %1655  ;;  %v2051_v28 = vmul.f32 %v1654_v24, %v550_v25 }
 0x3e4   :  { %v1658_v32 = vpop.eup %1657  ;;  %v2055_v29 = vmul.f32 %v1656_v27, %v550_v25 }
 0x3e5   :  { %1049 = vperm.xlu0 %1639, %v2040_v50   ;;  %v1660_v30 = vpop.eup %1659  ;;  %v2057_v49 = vmul.f32 %v1658_v32, %v557_v53 }
 0x3e6   :  { %610 = vperm.xlu1 %1640, %v2045_v23   ;;  %v1662_v51 = vpop.eup %1661  ;;  %v2061_v31 = vmul.f32 %v1660_v30, %v557_v53 }
 0x3e7   :  { %v1664_v33 = vpop.eup %1663  ;;  %v2063_v34 = vmul.f32 %v1662_v51, %v564_v52 }
 0x3e8   :  { %v1666_v55 = vpop.eup %1665  ;;  %v2067_v54 = vmul.f32 %v1664_v33, %v564_v52 }
 0x3e9   :  { %1052 = vperm.xlu0 %1639, %v2049_v6   ;;  %v1668_v37 = vpop.eup %1667  ;;  %v2069_v38 = vmul.f32 %v1666_v55, %v571_v36 }
 0x3ea   :  { %613 = vperm.xlu1 %1640, %v2051_v28   ;;  %v1670_v40 = vpop.eup %1669  ;;  %v2073_v42 = vmul.f32 %v1668_v37, %v571_v36 }
 0x3eb   :  { %v1672_v45 = vpop.eup %1671  ;;  %v2075_v48 = vmul.f32 %v1670_v40, %v578_v58 }
 0x3ec   :  { %v2079_v63 = vmul.f32 %v1672_v45, %v578_v58 }
 0x3ed   :  { %1055 = vperm.xlu0 %1639, %v2055_v29  }
 0x3ee   :  { %616 = vperm.xlu1 %1640, %v2057_v49  }
 0x3f1   :  { %1058 = vperm.xlu0 %1639, %v2061_v31  }
 0x3f2   :  { %619 = vperm.xlu1 %1640, %v2063_v34  }
 0x3f5   :  { %1061 = vperm.xlu0 %1639, %v2067_v54  }
 0x3f6   :  { %622 = vperm.xlu1 %1640, %v2069_v38  }
 0x3f9   :  { %1064 = vperm.xlu0 %1639, %v2073_v42  }
 0x3fa   :  { %625 = vperm.xlu1 %1640, %v2075_v48  }
 0x3fd   :  { %1067 = vperm.xlu0 %1639, %v2079_v63  }
 0x457   :  { %v608_v57 = vpop.permute.xlu1 %607 }
 0x458   :  { %v634_v15 = vrot.slane %v608_v57, %v1879_v59 }
 0x45c   :  { %v605_v14 = vpop.permute.xlu0 %604 }
 0x45d   :  { %v1047_v2 = vpop.permute.xlu1 %1046  ;;  %v630_v17 = vrot.slane %v605_v14, %v1879_v59 }
 0x45e   :  { %v1072_v11 = vrot.slane %v1047_v2, %v1879_v59 }
 0x45f   :  { %v659_v25 = vsel %vm439_vm11, %v634_v15, %v630_v17 }
 0x460   :  { %v1050_v5 = vpop.permute.xlu0 %1049 }
 0x461   :  { %v611_v61 = vpop.permute.xlu1 %610  ;;  %v1076_v21 = vrot.slane %v1050_v5, %v1879_v59 }
 0x462   :  { %v638_v3 = vrot.slane %v611_v61, %v1879_v59 }
 0x463   :  { %v1101_v55 = vsel %vm439_vm11, %v1076_v21, %v1072_v11 }
 0x464   :  { %v1053_v8 = vpop.permute.xlu0 %1052  ;;  %v660_v32 = vsel %vm441_vm12, %v638_v3, %v659_v25 }
 0x465   :  { %v614_v60 = vpop.permute.xlu1 %613  ;;  %v1080_v26 = vrot.slane %v1053_v8, %v1879_v59 }
 0x466   :  { %v642_v18 = vrot.slane %v614_v60, %v1879_v59 }
 0x467   :  { %v1102_v58 = vsel %vm441_vm12, %v1080_v26, %v1101_v55 }
 0x468   :  { %v1056_v10 = vpop.permute.xlu0 %1055  ;;  %v661_v51 = vsel %vm443_vm13, %v642_v18, %v660_v32 }
 0x469   :  { %v617_v12 = vpop.permute.xlu1 %616  ;;  %v1084_v53 = vrot.slane %v1056_v10, %v1879_v59 }
 0x46a   :  { %v646_v19 = vrot.slane %v617_v12, %v1879_v59 }
 0x46b   :  { %v1103_v2 = vsel %vm443_vm13, %v1084_v53, %v1102_v58 }
 0x46c   :  { %v1059_v4 = vpop.permute.xlu0 %1058  ;;  %v662_v36 = vsel %vm445_vm14, %v646_v19, %v661_v51 }
 0x46d   :  { %v620_v13 = vpop.permute.xlu1 %619  ;;  %v1088_v52 = vrot.slane %v1059_v4, %v1879_v59 }
 0x46e   :  { %v650_v27 = vrot.slane %v620_v13, %v1879_v59 }
 0x46f   :  { %v1104_v61 = vsel %vm445_vm14, %v1088_v52, %v1103_v2 }
 0x470   :  { %v1062_v20 = vpop.permute.xlu0 %1061  ;;  %v663_v45 = vsel %vm447_vm15, %v650_v27, %v662_v36 }
 0x471   :  { %v623_v24 = vpop.permute.xlu1 %622  ;;  %v1092_v37 = vrot.slane %v1062_v20, %v1879_v59 }
 0x472   :  { %v654_v30 = vrot.slane %v623_v24, %v1879_v59 }
 0x473   :  { %v1105_v10 = vsel %vm447_vm15, %v1092_v37, %v1104_v61  ;;  %v1309_v37 = vld [vmem:[#allocation5 + $0x8] sm:$0xff] }
 0x474   :  { %v1065_v33 = vpop.permute.xlu0 %1064  ;;  %v664_v5 = vsel %vm449_vm1, %v654_v30, %v663_v45 }
 0x475   :  { %v626_v40 = vpop.permute.xlu1 %625  ;;  %v1096_v57 = vrot.slane %v1065_v33, %v1879_v59 }
 0x476   :  { %v658_v14 = vrot.slane %v626_v40, %v1879_v59 }
 0x477   :  { %v1106_v13 = vsel %vm449_vm1, %v1096_v57, %v1105_v10 }
 0x478   :  { %v1068_v8 = vpop.permute.xlu0 %1067  ;;  %v665_v60 = vsel %vm451_vm2, %v658_v14, %v664_v5 }
 0x479   :  { %v1100_v12 = vrot.slane %v1068_v8, %v1879_v59  ;;  %v667_v4 = vsel %vm372_vm10, %v665_v60, 0.0 }
 0x47a   :  { %668 = vadd.xlane.f32.xlu1 %v667_v4 }
 0x47b   :  { %v1107_v15 = vsel %vm451_vm2, %v1100_v12, %v1106_v13 }
 0x47c   :  { %v1109_v17 = vsel %vm372_vm10, %v1107_v15, 0.0 }
 0x47d   :  { %1110 = vadd.xlane.f32.xlu0 %v1109_v17 }
 0x503   :  { %v669_v3 = vpop.xlane.xlu1 %668 }
 0x504   :  { %1673 = vrcp.f32 %v669_v3 }
 0x506   :  { %v1111_v18 = vpop.xlane.xlu0 %1110 }
 0x507   :  { %1675 = vrcp.f32 %v1111_v18 }
 0x511   :  { %v1674_v20 = vpop.eup %1673 }
 0x512   :  { %v679_v11 = vrot.slane %v1674_v20, %v1957_v44  ;;  %v675_v21 = vrot.slane %v1674_v20, %v1808_v22  ;;  %v683_v51 = vrot.slane %v1674_v20, %v1944_v39 }
 0x514   :  { %v1676_v19 = vpop.eup %1675  ;;  %v713_v24 = vmul.f32 %v679_v11, %v2010_v35  ;;  %v712_v25 = vmul.f32 %v675_v21, %v2034_v47  ;;  %v714_v47 = vmul.f32 %v683_v51, %v2045_v23 }
 0x515   :  { %v1121_v26 = vrot.slane %v1676_v19, %v1957_v44  ;;  %v1117_v27 = vrot.slane %v1676_v19, %v1808_v22  ;;  %v1125_v30 = vrot.slane %v1676_v19, %v1944_v39  ;;  %v1129_v44 = vrot.slane %v1676_v19, %v1949_v41 }
 0x516   :  { %732 = vperm.xlu1 %1640, %v713_v24   ;;  %729 = vperm.xlu0 %1639, %v712_v25   ;;  %v687_v22 = vrot.slane %v1674_v20, %v1949_v41  ;;  %v1133_v52 = vrot.slane %v1676_v19, %v1967_v62  ;;  %v691_v39 = vrot.slane %v1674_v20, %v1967_v62 }
 0x517   :  { %v1155_v32 = vmul.f32 %v1121_v26, %v2040_v50  ;;  %v1154_v53 = vmul.f32 %v1117_v27, %v2038_v7  ;;  %v1156_v35 = vmul.f32 %v1125_v30, %v2049_v6  ;;  %v1157_v50 = vmul.f32 %v1129_v44, %v2055_v29 }
 0x518   :  { %v715_v7 = vmul.f32 %v687_v22, %v2051_v28  ;;  %v1158_v6 = vmul.f32 %v1133_v52, %v2061_v31  ;;  %v716_v23 = vmul.f32 %v691_v39, %v2057_v49  ;;  %v1137_v33 = vrot.slane %v1676_v19, %v1954_v43 }
 0x519   :  { %v695_v41 = vrot.slane %v1674_v20, %v1954_v43  ;;  %v1141_v55 = vrot.slane %v1676_v19, %v1974_v1  ;;  %v699_v62 = vrot.slane %v1674_v20, %v1974_v1  ;;  %v1145_v36 = vrot.slane %v1676_v19, %v1962_v46  ;;  %v864_v1 = vld [vmem:[#allocation5] sm:$0xff] }
 0x51a   :  { %1174 = vperm.xlu0 %1639, %v1155_v32   ;;  %1171 = vperm.xlu1 %1640, %v1154_v53   ;;  %v1159_v29 = vmul.f32 %v1137_v33, %v2067_v54  ;;  %v703_v43 = vrot.slane %v1674_v20, %v1962_v46 }
 0x51b   :  { %v717_v28 = vmul.f32 %v695_v41, %v2063_v34  ;;  %v1160_v31 = vmul.f32 %v1141_v55, %v2073_v42  ;;  %v718_v49 = vmul.f32 %v699_v62, %v2069_v38  ;;  %v1161_v54 = vmul.f32 %v1145_v36, %v2079_v63 }
 0x51c   :  { %v719_v34 = vmul.f32 %v703_v43, %v2075_v48  ;;  %v1464_v38 = vadd.s32 4294967292, %v1871_v56  ;;  %v1505_v42 = vadd.s32 4294967284, %v1871_v56 }
 0x51e   :  { %1177 = vperm.xlu0 %1639, %v1156_v35   ;;  %735 = vperm.xlu1 %1640, %v714_v47   ;;  %v2149_v46 = vsub.s32 %v1464_v38, %v1803_v16  ;;  %v2155_v45 = vsub.s32 %v1505_v42, %v1803_v16 }
 0x522   :  { %1180 = vperm.xlu0 %1639, %v1157_v50   ;;  %738 = vperm.xlu1 %1640, %v715_v7  }
 0x526   :  { %1183 = vperm.xlu0 %1639, %v1158_v6   ;;  %741 = vperm.xlu1 %1640, %v716_v23  }
 0x52a   :  { %1186 = vperm.xlu0 %1639, %v1159_v29   ;;  %744 = vperm.xlu1 %1640, %v717_v28  }
 0x52e   :  { %1189 = vperm.xlu0 %1639, %v1160_v31   ;;  %747 = vperm.xlu1 %1640, %v718_v49  }
 0x532   :  { %1192 = vperm.xlu0 %1639, %v1161_v54   ;;  %750 = vperm.xlu1 %1640, %v719_v34  }
 0x536   :  { %1233 = vrot.lane.b32.xlu1 %v1797_v9, %s1755_s23  ;;  %1311 = vrot.lane.b32.xlu0 %v1309_v37, %s1756_s24 }
 0x53a   :  { %1388 = vrot.lane.b32.xlu1 %v864_v1, %s1756_s24 }
 0x591   :  { %v733_v63 = vpop.permute.xlu1 %732  ;;  %v730_v40 = vpop.permute.xlu0 %729 }
 0x592   :  { %v1472_v48 = vrot.slane %v733_v63, %v2149_v46  ;;  %v1468_v58 = vrot.slane %v730_v40, %v2149_v46  ;;  %v759_v26 = vrot.slane %v733_v63, %v1879_v59  ;;  %v755_v27 = vrot.slane %v730_v40, %v1879_v59 }
 0x594   :  { %v1497_v9 = vsel %vm439_vm11, %v1472_v48, %v1468_v58  ;;  %v784_v39 = vsel %vm439_vm11, %v759_v26, %v755_v27 }
 0x595   :  { %v1172_v57 = vpop.permute.xlu1 %1171  ;;  %v1175_v14 = vpop.permute.xlu0 %1174 }
 0x596   :  { %v1509_v2 = vrot.slane %v1172_v57, %v2155_v45  ;;  %v1513_v5 = vrot.slane %v1175_v14, %v2155_v45  ;;  %v1197_v30 = vrot.slane %v1172_v57, %v1879_v59  ;;  %v1201_v51 = vrot.slane %v1175_v14, %v1879_v59 }
 0x598   :  { %v1538_v61 = vsel %vm439_vm11, %v1513_v5, %v1509_v2  ;;  %v1226_v29 = vsel %vm439_vm11, %v1201_v51, %v1197_v30 }
 0x599   :  { %v736_v56 = vpop.permute.xlu1 %735  ;;  %v1178_v8 = vpop.permute.xlu0 %1177 }
 0x59a   :  { %v1476_v60 = vrot.slane %v736_v56, %v2149_v46  ;;  %v1517_v10 = vrot.slane %v1178_v8, %v2155_v45  ;;  %v763_v44 = vrot.slane %v736_v56, %v1879_v59  ;;  %v1205_v22 = vrot.slane %v1178_v8, %v1879_v59 }
 0x59c   :  { %v1498_v12 = vsel %vm441_vm12, %v1476_v60, %v1497_v9  ;;  %v1539_v16 = vsel %vm441_vm12, %v1517_v10, %v1538_v61  ;;  %v785_v31 = vsel %vm441_vm12, %v763_v44, %v784_v39  ;;  %v1227_v49 = vsel %vm441_vm12, %v1205_v22, %v1226_v29 }
 0x59d   :  { %v739_v4 = vpop.permute.xlu1 %738  ;;  %v1181_v13 = vpop.permute.xlu0 %1180 }
 0x59e   :  { %v1480_v15 = vrot.slane %v739_v4, %v2149_v46  ;;  %v1521_v17 = vrot.slane %v1181_v13, %v2155_v45  ;;  %v767_v50 = vrot.slane %v739_v4, %v1879_v59  ;;  %v1209_v6 = vrot.slane %v1181_v13, %v1879_v59 }
 0x5a0   :  { %v1499_v3 = vsel %vm443_vm13, %v1480_v15, %v1498_v12  ;;  %v1540_v18 = vsel %vm443_vm13, %v1521_v17, %v1539_v16  ;;  %v786_v54 = vsel %vm443_vm13, %v767_v50, %v785_v31  ;;  %v1228_v38 = vsel %vm443_vm13, %v1209_v6, %v1227_v49 }
 0x5a1   :  { %v742_v20 = vpop.permute.xlu1 %741  ;;  %v1184_v11 = vpop.permute.xlu0 %1183 }
 0x5a2   :  { %v1484_v21 = vrot.slane %v742_v20, %v2149_v46  ;;  %v1525_v19 = vrot.slane %v1184_v11, %v2155_v45  ;;  %v771_v23 = vrot.slane %v742_v20, %v1879_v59  ;;  %v1213_v36 = vrot.slane %v1184_v11, %v1879_v59 }
 0x5a4   :  { %v1500_v24 = vsel %vm445_vm14, %v1484_v21, %v1499_v3  ;;  %v1541_v25 = vsel %vm445_vm14, %v1525_v19, %v1540_v18  ;;  %v787_v42 = vsel %vm445_vm14, %v771_v23, %v786_v54  ;;  %v1229_v2 = vsel %vm445_vm14, %v1213_v36, %v1228_v38 }
 0x5a5   :  { %v745_v32 = vpop.permute.xlu1 %744  ;;  %v1187_v53 = vpop.permute.xlu0 %1186 }
 0x5a6   :  { %v1488_v35 = vrot.slane %v745_v32, %v2149_v46  ;;  %v1529_v47 = vrot.slane %v1187_v53, %v2155_v45  ;;  %v775_v28 = vrot.slane %v745_v32, %v1879_v59  ;;  %v1217_v34 = vrot.slane %v1187_v53, %v1879_v59 }
 0x5a8   :  { %v1501_v7 = vsel %vm447_vm15, %v1488_v35, %v1500_v24  ;;  %v1542_v52 = vsel %vm447_vm15, %v1529_v47, %v1541_v25  ;;  %v788_v58 = vsel %vm447_vm15, %v775_v28, %v787_v42  ;;  %v1230_v61 = vsel %vm447_vm15, %v1217_v34, %v1229_v2 }
 0x5a9   :  { %v748_v33 = vpop.permute.xlu1 %747  ;;  %v1190_v41 = vpop.permute.xlu0 %1189 }
 0x5aa   :  { %v1492_v55 = vrot.slane %v748_v33, %v2149_v46  ;;  %v1533_v62 = vrot.slane %v1190_v41, %v2155_v45  ;;  %v779_v43 = vrot.slane %v748_v33, %v1879_v59  ;;  %v1221_v63 = vrot.slane %v1190_v41, %v1879_v59 }
 0x5ac   :  { %v1502_v37 = vsel %vm449_vm1, %v1492_v55, %v1501_v7  ;;  %v1543_v1 = vsel %vm449_vm1, %v1533_v62, %v1542_v52  ;;  %v789_v5 = vsel %vm449_vm1, %v779_v43, %v788_v58  ;;  %v1231_v60 = vsel %vm449_vm1, %v1221_v63, %v1230_v61 }
 0x5ad   :  { %v751_v40 = vpop.permute.xlu1 %750  ;;  %v1193_v48 = vpop.permute.xlu0 %1192 }
 0x5ae   :  { %v783_v9 = vrot.slane %v751_v40, %v1879_v59  ;;  %v1496_v57 = vrot.slane %v751_v40, %v2149_v46  ;;  %v1225_v14 = vrot.slane %v1193_v48, %v1879_v59  ;;  %v1537_v20 = vrot.slane %v1193_v48, %v2155_v45 }
 0x5b0   :  { %v1503_v56 = vsel %vm451_vm2, %v1496_v57, %v1502_v37  ;;  %v790_v8 = vsel %vm451_vm2, %v783_v9, %v789_v5  ;;  %v1232_v46 = vsel %vm451_vm2, %v1225_v14, %v1231_v60  ;;  %v1544_v25 = vsel %vm451_vm2, %v1537_v20, %v1543_v1 }
 0x5b1   :  { %v1234_v10 = vpop.permute.xlu1 %1233  ;;  %1607 = vmatmul.mubr.msk.f32.vlgmr.msra.gmra.mxu0 %vm372_vm10, %v790_v8  ;;  %v1312_v12 = vpop.permute.xlu0 %1311 }
 0x5b2   :  { %1610 = vmatpush3.msra.mxu1 %v1234_v10  ;;  %1616 = vmatprep.mubr.msk.f32.mxu0 %vm1748_vm0, %v1747_v0 }
 0x5b3   :  { %1612 = vmatmul.mubr.msk.f32.vlgmr.msra.gmra.mxu1 %vm372_vm10, %v1232_v46  ;;  %1619 = vmatprep.subr.mxu1 %v1747_v0 }
 0x5b4   :  { %1621 = vmatprep.mubr.msk.f32.mxu1 %vm1748_vm0, %v1747_v0  ;;  %1615 = vmatpush3.msra.mxu0 %v1312_v12  ;;  %vm1548_vm0 = vcmask 97280  }
 0x5b5   :  { %v1389_v59 = vpop.permute.xlu1 %1388 }
 0x5b6   :  { %1620 = vmatpush3.msra.mxu1 %v1389_v59 }
 0x671   :  { %v859_v16 = vpop.f32.mrf.mxu0 }
 0x672   :  { %v863_v4 = vmax.f32 %v859_v16, 0.0 }
 0x673   :  { %v1608_v13 = vpop.f32.mrf.mxu0  ;;  %v1304_v15 = vpop.f32.mrf.mxu1 }
 0x674   :  { %v1308_v17 = vmax.f32 %v1304_v15, 0.0  ;;  %1622 = vmatmul.mubr.msk.f32.vlgmr.msra.gmra.mxu1 %vm372_vm10, %v863_v4 }
 0x675   :  { %v1613_v3 = vpop.f32.mrf.mxu1 }
 0x676   :  { %1617 = vmatmul.mubr.msk.f32.vlgmr.msra.gmra.mxu0 %vm372_vm10, %v1308_v17 }
 0x734   :  { %v1460_v18 = vpop.f32.mrf.mxu1 }
 0x736   :  { %v1383_v11 = vpop.f32.mrf.mxu0  ;;  %v1623_v0 = vpop.f32.mrf.mxu1 }
 0x737   :  { %v1461_v21 = vadd.f32 %v1460_v18, %v1383_v11 }
 0x738   :  { %v1618_v19 = vpop.f32.mrf.mxu0 }
 0x739   :  { %v1547_v24 = vsel %vm1546_vm3, %v1461_v21, %v1503_v56 }
 0x73a   :  { %v1549_v26 = vsel %vm1548_vm0, %v1547_v24, %v1544_v25 }
 0x73b   :  { %v1551_v27 = vsel %vm1550_vm4, %v1549_v26, 0.0 }
 0x73c   :  { %1552 = vst [vmem:[#allocation7] sm:$0xff] %v1551_v27 }
 0x73d   :  { %1728 = shalt.err (!%p1725_p0)
}
 0x73e   :  { %1562 = dma.vmem_to_hbm [thread:$0]  %s1560_s26, 128, %s2229_s2, [#allocation4]  }
 0x73f   :  { %1741 = dma.done.wait [#allocation4], 128  }
 0x740   :  { %1742 = vsyncadd [#allocation4], 4294967168 }
 0x741   :  { %1566 = vsyncpa [#allocation3], 1 }
 0x742   :  { %1567 = vsyncpa [#allocation6], 1 }
 0x743   :  { %1568 = vsyncpa [#allocation4], 1 }

</bundles_post_ra>
